<compile_context>
chip_gen: v6e
topology: v6e:2x2x1
jax: 0.10.0
libtpu: 0.0.40
codegen_flags: <defaults>
</compile_context>

<pallas_src>
import functools

import jax
import jax.numpy as jnp
from jax.experimental import pallas as pl
from jax.experimental.pallas import tpu as pltpu


def yolo_kernel(pred_ref, out_ref, *, anchors, stride, attrs, g):
    # pred_ref: VMEM (attrs, gg)  raw conv logits for this (batch, anchor) step
    # out_ref : VMEM (attrs, gg)  decoded detections, lane-dense layout
    A = len(anchors)
    gg = g * g
    a = pl.program_id(1)

    # Select this step's raw anchor (the /stride in the PyTorch code cancels
    # against the final *stride, so raw anchors are used directly).
    aw = jnp.float32(anchors[0][0])
    ah = jnp.float32(anchors[0][1])
    for i in range(1, A):
        sel = a == i
        aw = jnp.where(sel, jnp.float32(anchors[i][0]), aw)
        ah = jnp.where(sel, jnp.float32(anchors[i][1]), ah)

    # Grid offsets, pre-scaled by stride. col = gy*g + gx (gx fast).
    # floor((col + 0.5) / g): the 0.5/g margin dominates the float rounding of
    # (1/g)*col for any realistic g (error ~3e-4 vs margin ~1e-2 at g=52).
    col = jax.lax.broadcasted_iota(jnp.int32, (1, gg), 1).astype(jnp.float32)
    gy = jnp.floor((col + 0.5) * (1.0 / g))
    gx = col - gy * g
    gx_s = gx * stride
    gy_s = gy * stride

    def sig(p):
        # sigmoid with a single EUP transcendental (tanh); mul/add go to the VPU
        return 0.5 * jnp.tanh(0.5 * p) + 0.5

    # Rows 0:8 (x, y, w, h, conf, first classes) as one sublane-aligned slab;
    # per-row behaviour selected with an iota row mask (cheap VPU selects).
    head = min(8, attrs)
    slab = pred_ref[0:head, :]                                   # (head, gg)
    row = jax.lax.broadcasted_iota(jnp.int32, (head, gg), 0)
    s = sig(slab)
    e = jnp.exp(slab)              # only rows 2:4 kept (where-selected below);
    #                                unguarded exp matches the PyTorch reference
    grid_add = jnp.where(row == 0, gx_s, jnp.where(row == 1, gy_s, 0.0))
    anch_mul = jnp.where(row == 2, aw, ah)
    box = jnp.where(row < 2, s * stride + grid_add, e * anch_mul)
    out_ref[0:head, :] = jnp.where(row < 4, box, s)

    # Remaining class rows: plain sigmoid; slice starts at sublane 8 (aligned).
    if attrs > 8:
        out_ref[8:attrs, :] = sig(pred_ref[8:attrs, :])


def yolo_layer_forward(x, anchors, num_classes, img_dim):
    """x: (bs, num_anchors*(5+num_classes), g, g) float32, NCHW like PyTorch.

    Returns (bs, num_anchors*g*g, 5+num_classes), matching YOLOLayer(targets=None).
    """
    bs, C, g, g2 = x.shape
    assert g == g2
    A = len(anchors)
    attrs = 5 + num_classes
    assert C == A * attrs
    stride = float(img_dim) / float(g)
    gg = g * g

    # Free contiguous reshape: (bs, A*attrs, g, g) -> (bs, A, attrs, g*g).
    pred = x.reshape(bs, A, attrs, gg).astype(jnp.float32)

    kernel = functools.partial(
        yolo_kernel,
        anchors=[(float(aw), float(ah)) for (aw, ah) in anchors],
        stride=stride,
        attrs=attrs,
        g=g,
    )

    out = pl.pallas_call(
        kernel,
        out_shape=jax.ShapeDtypeStruct((bs, A, attrs, gg), jnp.float32),
        grid_spec=pltpu.PrefetchScalarGridSpec(
            num_scalar_prefetch=0,
            grid=(bs, A),
            in_specs=[
                pl.BlockSpec((None, None, attrs, gg), lambda b, a: (b, a, 0, 0)),
            ],
            out_specs=pl.BlockSpec((None, None, attrs, gg), lambda b, a: (b, a, 0, 0)),
        ),
        compiler_params=pltpu.CompilerParams(
            # both grid axes are independent per-block work: v7x's two
            # TensorCores get work even at bs == 1; v5e/v6e are unaffected.
            dimension_semantics=("parallel", "parallel"),
        ),
    )(pred)

    # Lane-dense kernel layout -> PyTorch output layout (one XLA permute pass).
    return out.transpose(0, 1, 3, 2).reshape(bs, A * gg, attrs)


def yolo_layer_reference(x, anchors, num_classes, img_dim):
    """Pure-JAX reference mirroring the PyTorch forward (targets=None)."""
    bs, C, g, _ = x.shape
    A = len(anchors)
    attrs = 5 + num_classes
    stride = float(img_dim) / float(g)
    pred = x.reshape(bs, A, attrs, g, g).transpose(0, 1, 3, 4, 2)
    sx = jax.nn.sigmoid(pred[..., 0])
    sy = jax.nn.sigmoid(pred[..., 1])
    w = pred[..., 2]
    h = pred[..., 3]
    conf = jax.nn.sigmoid(pred[..., 4])
    cls = jax.nn.sigmoid(pred[..., 5:])
    gx = jnp.broadcast_to(jnp.arange(g, dtype=jnp.float32)[None, :], (g, g))
    gy = jnp.broadcast_to(jnp.arange(g, dtype=jnp.float32)[:, None], (g, g))
    aw = jnp.array([a[0] / stride for a in anchors], jnp.float32)[None, :, None, None]
    ah = jnp.array([a[1] / stride for a in anchors], jnp.float32)[None, :, None, None]
    bx = sx + gx
    by = sy + gy
    bw = jnp.exp(w) * aw
    bh = jnp.exp(h) * ah
    boxes = jnp.stack([bx, by, bw, bh], -1).reshape(bs, -1, 4) * stride
    return jnp.concatenate(
        [boxes, conf.reshape(bs, -1, 1), cls.reshape(bs, -1, num_classes)], -1
    )


if __name__ == "__main__":
    # small, deterministic config
    anchors = [(10.0, 13.0), (16.0, 30.0), (33.0, 23.0)]
    num_classes = 3              # bbox_attrs = 8
    img_dim = 32
    bs, g = 2, 16
    A = len(anchors)
    attrs = 5 + num_classes

    key = jax.random.PRNGKey(0)
    x = jax.random.normal(key, (bs, A * attrs, g, g), dtype=jnp.float32)

    out = yolo_layer_forward(x, anchors, num_classes, img_dim)
    out = jax.block_until_ready(out)

    ref = yolo_layer_reference(x, anchors, num_classes, img_dim)
    assert out.shape == (bs, A * g * g, attrs), out.shape
    # tanh-form sigmoid is mathematically exact; any structural bug (wrong row,
    # grid offset, anchor, layout) would be orders of magnitude above 1e-3.
    assert jnp.allclose(out, ref, atol=1e-3, rtol=1e-3)

    # TODO(synk): training branch (targets is not None) needs build_target(),
    # which is host-side ground-truth bookkeeping with no clean Pallas equivalent.
    print("KERNEL_OK")
</pallas_src>

<mosaic_0001>
module attributes {stable_mosaic.version = 11 : i64} {
  func.func @yolo_kernel(%arg0: i32, %arg1: i32, %arg2: memref<1x1x8x256xf32, #tpu.memory_space<vmem>>, %arg3: memref<1x1x8x256xf32, #tpu.memory_space<vmem>>) attributes {dimension_semantics = [#tpu.dimension_semantics<parallel>, #tpu.dimension_semantics<parallel>], iteration_bounds = array<i64: 2, 3>, scalar_prefetch = 0 : i64, scratch_operands = 0 : i64, tpu.core_type = #tpu.core_type<tc>, window_params = [{transform_indices = @transform_0, window_bounds = array<i64: 1, 1, 8, 256>}, {transform_indices = @transform_1, window_bounds = array<i64: 1, 1, 8, 256>}]} {
    %c1_i32 = arith.constant 1 : i32
    %0 = arith.cmpi eq, %arg1, %c1_i32 : i32
    %cst = arith.constant 1.600000e+01 : f32
    %cst_0 = arith.constant 1.000000e+01 : f32
    %1 = arith.select %0, %cst, %cst_0 : f32
    %cst_1 = arith.constant 3.000000e+01 : f32
    %cst_2 = arith.constant 1.300000e+01 : f32
    %2 = arith.select %0, %cst_1, %cst_2 : f32
    %c2_i32 = arith.constant 2 : i32
    %3 = arith.cmpi eq, %arg1, %c2_i32 : i32
    %cst_3 = arith.constant 3.300000e+01 : f32
    %4 = arith.select %3, %cst_3, %1 : f32
    %cst_4 = arith.constant 2.300000e+01 : f32
    %5 = arith.select %3, %cst_4, %2 : f32
    %6 = tpu.iota {dimensions = array<i32: 1>} : vector<1x256xi32>
    %7 = arith.sitofp %6 : vector<1x256xi32> to vector<1x256xf32>
    %cst_5 = arith.constant 5.000000e-01 : f32
    %8 = vector.broadcast %cst_5 : f32 to vector<1x256xf32>
    %9 = arith.addf %7, %8 : vector<1x256xf32>
    %cst_6 = arith.constant 6.250000e-02 : f32
    %10 = vector.broadcast %cst_6 : f32 to vector<1x256xf32>
    %11 = arith.mulf %9, %10 : vector<1x256xf32>
    %12 = math.floor %11 : vector<1x256xf32>
    %cst_7 = arith.constant 1.600000e+01 : f32
    %13 = vector.broadcast %cst_7 : f32 to vector<1x256xf32>
    %14 = arith.mulf %12, %13 : vector<1x256xf32>
    %15 = arith.subf %7, %14 : vector<1x256xf32>
    %cst_8 = arith.constant 2.000000e+00 : f32
    %16 = vector.broadcast %cst_8 : f32 to vector<1x256xf32>
    %17 = arith.mulf %15, %16 : vector<1x256xf32>
    %cst_9 = arith.constant 2.000000e+00 : f32
    %18 = vector.broadcast %cst_9 : f32 to vector<1x256xf32>
    %19 = arith.mulf %12, %18 : vector<1x256xf32>
    %c0 = arith.constant 0 : index
    %c0_10 = arith.constant 0 : index
    %c0_11 = arith.constant 0 : index
    %c0_12 = arith.constant 0 : index
    %20 = vector.load %arg2[%c0, %c0_10, %c0_11, %c0_12] : memref<1x1x8x256xf32, #tpu.memory_space<vmem>>, vector<1x1x8x256xf32>
    %21 = vector.shape_cast %20 : vector<1x1x8x256xf32> to vector<8x256xf32>
    %22 = tpu.iota {dimensions = array<i32: 0>} : vector<8x256xi32>
    %cst_13 = arith.constant 5.000000e-01 : f32
    %23 = vector.broadcast %cst_13 : f32 to vector<8x256xf32>
    %24 = arith.mulf %23, %21 : vector<8x256xf32>
    %25 = math.tanh %24 : vector<8x256xf32>
    %cst_14 = arith.constant 5.000000e-01 : f32
    %26 = vector.broadcast %cst_14 : f32 to vector<8x256xf32>
    %27 = arith.mulf %26, %25 : vector<8x256xf32>
    %cst_15 = arith.constant 5.000000e-01 : f32
    %28 = vector.broadcast %cst_15 : f32 to vector<8x256xf32>
    %29 = arith.addf %27, %28 : vector<8x256xf32>
    %30 = math.exp %21 : vector<8x256xf32>
    %c0_i32 = arith.constant 0 : i32
    %31 = vector.broadcast %c0_i32 : i32 to vector<8x256xi32>
    %32 = arith.cmpi eq, %22, %31 : vector<8x256xi32>
    %c1_i32_16 = arith.constant 1 : i32
    %33 = vector.broadcast %c1_i32_16 : i32 to vector<8x256xi32>
    %34 = arith.cmpi eq, %22, %33 : vector<8x256xi32>
    %cst_17 = arith.constant 0.000000e+00 : f32
    %35 = vector.shape_cast %19 : vector<1x256xf32> to vector<1x256xf32>
    %36 = vector.broadcast %35 : vector<1x256xf32> to vector<8x256xf32>
    %37 = vector.broadcast %cst_17 : f32 to vector<8x256xf32>
    %38 = arith.select %34, %36, %37 : vector<8x256xi1>, vector<8x256xf32>
    %39 = vector.shape_cast %17 : vector<1x256xf32> to vector<1x256xf32>
    %40 = vector.broadcast %39 : vector<1x256xf32> to vector<8x256xf32>
    %41 = arith.select %32, %40, %38 : vector<8x256xi1>, vector<8x256xf32>
    %c2_i32_18 = arith.constant 2 : i32
    %42 = vector.broadcast %c2_i32_18 : i32 to vector<8x256xi32>
    %43 = arith.cmpi eq, %22, %42 : vector<8x256xi32>
    %44 = vector.broadcast %4 : f32 to vector<8x256xf32>
    %45 = vector.broadcast %5 : f32 to vector<8x256xf32>
    %46 = arith.select %43, %44, %45 : vector<8x256xi1>, vector<8x256xf32>
    %c2_i32_19 = arith.constant 2 : i32
    %47 = vector.broadcast %c2_i32_19 : i32 to vector<8x256xi32>
    %48 = arith.cmpi slt, %22, %47 : vector<8x256xi32>
    %cst_20 = arith.constant 2.000000e+00 : f32
    %49 = vector.broadcast %cst_20 : f32 to vector<8x256xf32>
    %50 = arith.mulf %29, %49 : vector<8x256xf32>
    %51 = arith.addf %50, %41 : vector<8x256xf32>
    %52 = arith.mulf %30, %46 : vector<8x256xf32>
    %53 = arith.select %48, %51, %52 : vector<8x256xi1>, vector<8x256xf32>
    %c4_i32 = arith.constant 4 : i32
    %54 = vector.broadcast %c4_i32 : i32 to vector<8x256xi32>
    %55 = arith.cmpi slt, %22, %54 : vector<8x256xi32>
    %56 = arith.select %55, %53, %29 : vector<8x256xi1>, vector<8x256xf32>
    %c0_21 = arith.constant 0 : index
    %c0_22 = arith.constant 0 : index
    %c0_23 = arith.constant 0 : index
    %c0_24 = arith.constant 0 : index
    %57 = vector.load %arg3[%c0_21, %c0_22, %c0_23, %c0_24] : memref<1x1x8x256xf32, #tpu.memory_space<vmem>>, vector<1x1x8x256xf32>
    %58 = vector.shape_cast %57 : vector<1x1x8x256xf32> to vector<8x256xf32>
    %59 = vector.shape_cast %56 : vector<8x256xf32> to vector<1x1x8x256xf32>
    tpu.vector_store %arg3[%c0_21, %c0_22, %c0_23, %c0_24], %59 {strides = array<i32>} : memref<1x1x8x256xf32, #tpu.memory_space<vmem>>, vector<1x1x8x256xf32>,
    return
  }
  func.func @transform_0(%arg0: i32, %arg1: i32) -> (i32, i32, i32, i32) {
    %c0_i32 = arith.constant 0 : i32
    %c0_i32_0 = arith.constant 0 : i32
    %c0_i32_1 = arith.constant 0 : i32
    return %arg0, %arg1, %c0_i32, %c0_i32_0 : i32, i32, i32, i32
  }
  func.func @transform_1(%arg0: i32, %arg1: i32) -> (i32, i32, i32, i32) {
    %c0_i32 = arith.constant 0 : i32
    %c0_i32_0 = arith.constant 0 : i32
    %c0_i32_1 = arith.constant 0 : i32
    return %arg0, %arg1, %c0_i32, %c0_i32_0 : i32, i32, i32, i32
  }
}

</mosaic_0001>

<bundles_post_ra>
// kernel: tpu_custom_call.1
= control target key start
LH: loop header
LB: loop body
LE: loop exit
PB: predicated region body
PF: predicated region fallthrough
CT: control target
= control target key end

     0   :  { %6 = vsyncpa [#allocation3], 0  ;;  %s733_s0 = inlined_call_operand.hbm [shape: f32[2,3,8,256], index: 0, kind: input, shape index: {}]   ;;  %s734_s1 = inlined_call_operand.hbm [shape: f32[2,3,8,256], index: 1, kind: output, shape index: {}]  }
   0x1   :  { %8 = vsyncpa [#allocation3 + $0x1], 0 }
   0x2   :  { %9 = vsyncpa [#allocation4], 0 }
   0x3   :  { %11 = vsyncpa [#allocation4 + $0x1], 0  ;;  %s561_s6 = smov 0   ;;  %s563_s7 = smov 0  }
   0x4   :  { %s565_s8 = smov 0   ;;  %s567_s9 = smov 0  }
   0x5   :  { %s569_s10 = smov 0   ;;  %s571_s11 = smov 0  }
   0x6   :  { %s573_s12 = smov 0   ;;  %s575_s13 = smov 0  }
   0x7 LB: > { %s320_s14 = sadd.s32 4294967295, %s547_s13   ;;  %s321_s15 = sadd.s32 4294967294, %s547_s13   ;;  %s547_s13 = sphi %s575_s13, %s17_s13   ;;  %s543_s12 = sphi %s573_s12, %s747_s12   ;;  %s539_s11 = sphi %s571_s11, %s746_s11   ;;  %s535_s10 = sphi %s569_s10, %s745_s10   ;;  %s531_s9 = sphi %s567_s9, %s744_s9   ;;  %s527_s8 = sphi %s565_s8, %s743_s8   ;;  %s523_s7 = sphi %s563_s7, %s742_s7   ;;  %s519_s6 = sphi %s561_s6, %s741_s6  }
   0x8   : > { %s26_s16 = sadd.s32 1, %s539_s11  ;;  %s29_s17 = sadd.s32 1, %s543_s12 }
   0x9   : > { %p27_p0 = scmp.ge.s32.totalorder %s26_s16, 3  ;;  %s38_s18 = sadd.s32 1, %s527_s8 }
   0xa   : > { %p45_p1 = scmp.ne.s32.totalorder %s527_s8, %s523_s7  ;;  %p46_p2 = scmp.eq.s32.totalorder %s547_s13, 0 }
   0xb   : > { %s749_s16 = smov (%p27_p0, %s26_s16), 0  ;;  %s751_s17 = smov (!%p27_p0, %s29_s17), %s543_s12 }
   0xc   : > { %s34_s19 = ssub.s32 %s539_s11, %s749_s16  ;;  %p614_p3 = por %p46_p2, %p45_p1 }
   0xd   : > { %p31_p4 = scmp.ge.s32.totalorder %s751_s17, 2  ;;  %p51_p5 = scmp.ne.s32.totalorder %s523_s7, %s519_s6 }
   0xe   : > { %p52_p6 = scmp.eq.s32.totalorder %s320_s14, 0  ;;  %p77_p7 = scmp.eq.s32.totalorder %s320_s14, 5 }
   0xf   : > { %s753_s17 = smov (%p31_p4, %s751_s17), 0  ;;  %p83_p10 = scmp.eq.s32.totalorder %s321_s15, 5 }
  0x10   : > { %p622_p8 = por %p52_p6, %p51_p5  ;;  %p626_p9 = por %p77_p7, %p45_p1 }
  0x11   : > { %s33_s23 = ssub.s32 %s543_s12, %s753_s17  ;;  %p632_p12 = por %p83_p10, %p51_p5 }
  0x12   : > { %s35_s24 = sor.u32 %s34_s19, %s33_s23  ;;  %p349_p13 = scmp.lt.s32.totalorder %s547_s13, 6 }
  0x13   : > { %p36_p11 = scmp.eq.s32.totalorder %s35_s24, 0  ;;  %s103_s26 = sand.u32 1, %s527_s8  }
  0x14   : > { %s738_s25 = scalar_select %p632_p12, 1, 0 }
  0x15   : > { %s639_s27 = scalar_select %p36_p11, %s527_s8, %s38_s18  }
  0x16   : > { %s324_s28 = sshll.u32 %s103_s26, 4  ;;  %s325_s29 = sshll.u32 %s539_s11, 1 }
  0x17   : > { %s335_s30 = smul.u32 6, %s543_s12  ;;  %s107_s2 = scalar_lea.vmem [#allocation2], %s324_s28 }
  0x18   : > { %s117_s3 = sshll.u32 %s107_s2, 4  ;;  %p645_p0 = pnand %p349_p13, %p614_p3  ;;  %s118_s3 = int_to_ptr.vmem [resolvable:$true] %s117_s3 }
  0x19   : > { %s113_s5 = sadd.s32 %s335_s30, %s325_s29  ;;  %p327_p1 = scmp.ge.s32.totalorder %s547_s13, 1 }
  0x1a   : > { %s326_s14 = sshll.u32 %s113_s5, 7  ;;  %p122_p2 = scmp.lt.s32.totalorder %s547_s13, 7 }
  0x1b   : > { %s115_s18 = scalar_lea.hbm %s733_s0, %s326_s14  ;;  %s104_s23 = scalar_lea.sflag [#allocation3], %s103_s26 }
  0x1c   : > { %p425_p4 = pneg %p645_p0  ;;  %s436_s24 = scalar_lea.vmem %s118_s3, 256 }
  0x1d   : > { %p437_p5 = scmp.ne.s32.totalorder %s118_s3, %s436_s24  ;;  %s549_s20 = smov [#allocation2]  }
  0x1e   : > { %s441_s28 = sshll.u32 %s549_s20, 4  ;;  %s442_s28 = int_to_ptr.vmem [resolvable:$false] %s441_s28 }
  0x1f   : > { %p439_p6 = pnand %p437_p5, %p425_p4  ;;  %s443_s2 = scalar_lea.vmem %s442_s28, 512 }
  0x20   : > { %p444_p3 = scmp.lt.s32.totalorder %s118_s3, %s442_s28  ;;  %p445_p10 = scmp.lt.s32.totalorder %s443_s2, %s436_s24 }
  0x21   : > { %p440_p7 = pneg %p439_p6 }
  0x22   : > { %p446_p11 = por %p445_p10, %p444_p3 }
  0x24   : > { %p447_p13 = pnand %p446_p11, %p440_p7 }
  0x26   : > { %450 = shalt.err (!%p447_p13)
}
  0x27   : > { %344 = dma.hbm_to_vmem [thread:$0]  (!%p645_p0), %s115_s18, 256, %s118_s3, %s104_s23  }
  0x28   : > { %p123_p12 = pnand %p327_p1, %p122_p2 }
  0x29   : > { %s663_s26 = sand.u32 (!%p123_p12), 1, %s523_s7  }
  0x2a   : > { %126 = sbr.rel (%p123_p12) target bundleno = 90 (0x5a), region = 24  ;;  %s328_s29 = sshll.u32 (!%p123_p12), %s663_s26, 4 }
  0x2b   : > { %s129_s30 = scalar_lea.sflag (!%p123_p12), [#allocation3], %s663_s26  ;;  %s132_s5 = scalar_lea.vmem (!%p123_p12), [#allocation2], %s328_s29 }
  0x2f   : > { %510 = dma.done.wait (%p622_p8), %s129_s30, 256  }
  0x30   : > { %512 = vsyncadd (%p622_p8), %s129_s30, 4294967040  ;;  %v157_v0 = vlaneseq  ;;  %v176_v5 = vld [vmem:[%s132_s5] sm:$0xff]  ;;  %v177_v7 = vld [vmem:[%s132_s5 + $0x8] sm:$0xff]  ;;  %p151_p12 = scmp.eq.s32.totalorder %s531_s9, 1  ;;  %p154_p8 = scmp.eq.s32.totalorder %s531_s9, 2 }
  0x31   : > { %v180_v9 = vmul.f32 0.5, %v176_v5  ;;  %v188_v10 = vmul.f32 1.442695, %v176_v5  ;;  %v181_v12 = vmul.f32 0.5, %v177_v7  ;;  %v190_v13 = vmul.f32 1.442695, %v177_v7 }
  0x32   : > { %v158_v1 = vand.u32 127, %v157_v0  ;;  %s152_s21 = scalar_select %p151_p12, 16.0, 10.0  ;;  %v179_v18 = vshrl.u32 %v157_v0, 7 }
  0x33   : > { %415 = vtanh.f32 %v180_v9  ;;  %s153_s3 = scalar_select %p151_p12, 30.0, 13.0 }
  0x34   : > { %v160_v2 = vcvt.s32.f32 %v158_v1  ;;  %v159_v3 = vadd.s32 128, %v158_v1  ;;  %417 = vpow2.f32 %v188_v10  ;;  %s755_s21 = smov (%p154_p8, %s152_s21), 33.0  ;;  %vm193_vm0 = vcmp.eq.s32.totalorder %v179_v18, 1  ;;  %s336_s4 = smul.u32 6, %s535_s10 }
  0x35   : > { %419 = vtanh.f32 %v181_v12  ;;  %s757_s3 = smov (%p154_p8, %s153_s3), 23.0  ;;  %vm198_vm1 = vcmp.eq.s32.totalorder %v179_v18, 2  ;;  %v199_v23 = vstv %s755_s21  ;;  %vm192_vm2 = vcmp.eq.s32.totalorder %v179_v18, 0  ;;  %s331_s14 = sshll.u32 %s531_s9, 1 }
  0x36   : > { %v162_v4 = vadd.f32 0.5, %v160_v2  ;;  %v161_v6 = vcvt.s32.f32 %v159_v3  ;;  %421 = vpow2.f32 %v190_v13  ;;  %v200_v24 = vstv %s757_s3  ;;  %s229_s15 = sadd.s32 %s336_s4, %s331_s14  ;;  %s150_s10 = scalar_lea.vmem [#allocation5], %s328_s29 }
  0x37   : > { %v201_v32 = vsel %vm198_vm1, %v199_v23, %v200_v24  ;;  %vm202_vm3 = vcmp.lt.s32.totalorder %v179_v18, 2  ;;  %vm211_vm4 = vcmp.lt.s32.totalorder %v179_v18, 4  ;;  %s233_s9 = sshll.u32 %s150_s10, 4  ;;  %s332_s19 = sshll.u32 %s229_s15, 7  ;;  %s683_s9 = int_to_ptr.vmem [resolvable:$true] %s233_s9 }
  0x38   : > { %v164_v8 = vmul.f32 0.0625, %v162_v4  ;;  %v163_v11 = vadd.f32 0.5, %v161_v6  ;;  %s231_s24 = scalar_lea.hbm %s734_s1, %s332_s19  ;;  %s217_s20 = scalar_lea.sflag [#allocation4], %s663_s26 }
  0x39   : > { %s451_s28 = scalar_lea.vmem %s683_s9, 256  ;;  %s550_s2 = smov [#allocation5]  }
  0x3a   : > { %v166_v14 = vfloor.f32 %v164_v8  ;;  %v165_v15 = vmul.f32 0.0625, %v163_v11  ;;  %p452_p0 = scmp.ne.s32.totalorder %s683_s9, %s451_s28  ;;  %s455_s29 = sshll.u32 %s550_s2, 4  ;;  %s456_s29 = int_to_ptr.vmem [resolvable:$false] %s455_s29 }
  0x3b   : > { %s457_s30 = scalar_lea.vmem %s456_s29, 512  ;;  %p458_p4 = scmp.lt.s32.totalorder %s683_s9, %s456_s29 }
  0x3c   : > { %v167_v16 = vfloor.f32 %v165_v15  ;;  %v168_v17 = vmul.f32 16.0, %v166_v14  ;;  %v174_v21 = vmul.f32 2.0, %v166_v14  ;;  %p453_p1 = pnand %p452_p0, %p626_p9  ;;  %p459_p5 = scmp.lt.s32.totalorder %s457_s30, %s451_s28 }
  0x3e   : > { %v169_v19 = vmul.f32 16.0, %v167_v16  ;;  %v170_v20 = vsub.f32 %v160_v2, %v168_v17  ;;  %v175_v25 = vmul.f32 2.0, %v167_v16  ;;  %v194_v30 = vsel %vm193_vm0, %v174_v21, 0.0  ;;  %p454_p2 = pneg %p453_p1  ;;  %p460_p6 = por %p459_p5, %p458_p4 }
  0x40   : > { %v171_v22 = vsub.f32 %v161_v6, %v169_v19  ;;  %v416_v26 = vpop.eup %415  ;;  %v172_v27 = vmul.f32 2.0, %v170_v20  ;;  %v195_v36 = vsel %vm193_vm0, %v175_v25, 0.0  ;;  %p461_p7 = pnand %p460_p6, %p454_p2 }
  0x41   : > { %v418_v28 = vpop.eup %417  ;;  %v184_v29 = vmul.f32 0.5, %v416_v26 }
  0x42   : > { %v420_v31 = vpop.eup %419  ;;  %v173_v33 = vmul.f32 2.0, %v171_v22  ;;  %v196_v38 = vsel %vm192_vm2, %v172_v27, %v194_v30  ;;  %v207_v40 = vmul.f32 %v418_v28, %v201_v32 }
  0x43   : > { %v186_v34 = vadd.f32 0.5, %v184_v29  ;;  %v185_v35 = vmul.f32 0.5, %v420_v31  ;;  %v422_v37 = vpop.eup %421 }
  0x44   : > { %v197_v42 = vsel %vm192_vm2, %v173_v33, %v195_v36  ;;  %v208_v45 = vmul.f32 %v422_v37, %v201_v32 }
  0x45   : > { %v203_v39 = vmul.f32 2.0, %v186_v34  ;;  %v187_v41 = vadd.f32 0.5, %v185_v35 }
  0x47   : > { %v205_v43 = vadd.f32 %v203_v39, %v196_v38  ;;  %v204_v44 = vmul.f32 2.0, %v187_v41 }
  0x49   : > { %v209_v46 = vsel %vm202_vm3, %v205_v43, %v207_v40  ;;  %v206_v47 = vadd.f32 %v204_v44, %v197_v42 }
  0x4a   : > { %v212_v48 = vsel %vm211_vm4, %v209_v46, %v186_v34 }
  0x4b   : > { %214 = vst [vmem:[%s150_s10] sm:$0xff] %v212_v48  ;;  %v210_v49 = vsel %vm202_vm3, %v206_v47, %v208_v45 }
  0x4c   : > { %v213_v50 = vsel %vm211_vm4, %v210_v49, %v187_v41 }
  0x4d   : > { %215 = vst [vmem:[%s150_s10 + $0x8] sm:$0xff] %v213_v50 }
  0x4e   : > { %464 = shalt.err (!%p461_p7)
}
  0x4f   : > { %s465_s5 = scalar_lea.hbm %s231_s24, 256  ;;  %s469_s3 = scalar_lea.hbm %s734_s1, 1536 }
  0x50   : > { %p466_p3 = scmp.ne.s32.totalorder %s231_s24, %s465_s5  ;;  %p470_p13 = scmp.lt.s32.totalorder %s231_s24, %s734_s1 }
  0x51   : > { %p471_p12 = scmp.lt.s32.totalorder %s469_s3, %s465_s5 }
  0x52   : > { %p467_p10 = pnand %p466_p3, %p626_p9 }
  0x53   : > { %p472_p8 = por %p471_p12, %p470_p13 }
  0x54   : > { %p468_p11 = pneg %p467_p10 }
  0x56   : > { %p473_p0 = pnand %p472_p8, %p468_p11 }
  0x58   : > { %476 = shalt.err (!%p473_p0)
}
  0x59   : > { %339 = dma.vmem_to_hbm [thread:$0]  (%p626_p9), %s683_s9, 256, %s231_s24, %s217_s20  }
  0x5a PF: > { %p350_p1 = scmp.ge.s32.totalorder %s547_s13, 2  ;;  %s245_s15 = sand.u32 1, %s519_s6  }
  0x5b   : > { %p740_p2 = scmp.ne.s32.totalorder %s738_s25, 0  ;;  %s246_s10 = scalar_lea.sflag [#allocation4], %s245_s15 }
  0x5d   : > { %p346_p4 = pnand %p350_p1, %p740_p2 }
  0x5f   : > { %p347_p5 = pneg %p346_p4 }
  0x61   : > { %514 = dma.done.wait (%p347_p5), %s246_s10, 256  }
  0x62   : > { %516 = vsyncadd (%p347_p5), %s246_s10, 4294967040  ;;  %s17_s13 = sadd.s32 1, %s547_s13   ;;  %s741_s6 = smov %s523_s7 }
  0x63   : > { %p14_p6 = scmp.ge.s32.totalorder %s17_s13, 8   ;;  %s742_s7 = smov %s527_s8 }
  0x64   : > { %s743_s8 = smov %s639_s27  ;;  %s744_s9 = smov %s539_s11 }
  0x65   : > { %s745_s10 = smov %s543_s12  ;;  %s746_s11 = smov %s749_s16 }
  0x66   : > { %s747_s12 = smov %s753_s17  ;;  %16 = sbr.rel (!%p14_p6) target bundleno = 7 (0x7), region = 69 }
  0x6b   :  { %251 = vsyncpa [#allocation3], 1 }
  0x6c   :  { %253 = vsyncpa [#allocation3 + $0x1], 1 }
  0x6d   :  { %254 = vsyncpa [#allocation4], 1 }
  0x6e   :  { %256 = vsyncpa [#allocation4 + $0x1], 1 }

</bundles_post_ra>
